<compile_context>
chip_gen: v5e
topology: v5e:2x2
jax: 0.10.0
libtpu: 0.0.40
codegen_flags: <defaults>
</compile_context>

<pallas_src>
import jax
import jax.numpy as jnp
from jax.experimental import pallas as pl
from jax.experimental.pallas import tpu as pltpu


def _round_up(x, m):
    return ((x + m - 1) // m) * m


def dqn_kernel(x_ref, w1_ref, b1_ref, w2_ref, b2_ref, w3_ref, b3_ref, out_ref):
    """One batch tile of fc1 -> ReLU -> fc2 -> ReLU -> fc3.

    Weights may be f32 or bf16; all MXU accumulation is f32 and the bias-add/ReLU
    epilogue stays f32 (v5e's VPU has no bf16; free on v6e/v7x since VPU slot is idle).
    """
    w_dtype = w1_ref.dtype
    x = x_ref[...]

    h1 = jnp.dot(x, w1_ref[...], preferred_element_type=jnp.float32)
    h1 = jnp.maximum(h1 + b1_ref[...], 0.0)

    h2 = jnp.dot(h1.astype(w_dtype), w2_ref[...], preferred_element_type=jnp.float32)
    h2 = jnp.maximum(h2 + b2_ref[...], 0.0)

    out = jnp.dot(h2.astype(w_dtype), w3_ref[...], preferred_element_type=jnp.float32)
    out_ref[...] = (out + b3_ref[...]).astype(out_ref.dtype)


def dqn_forward(state, params, *, block_batch=None, compute_dtype=jnp.float32):
    """DeepQNetwork forward pass in one Pallas kernel.

    state:  [batch, input_dim] float32
    params: dict with w1 [in, fc1], b1 [1, fc1], w2 [fc1, fc2], b2 [1, fc2],
            w3 [fc2, out], b3 [1, out]
    returns [batch, out] float32 Q-values.
    """
    w1, b1 = params["w1"], params["b1"]
    w2, b2 = params["w2"], params["b2"]
    w3, b3 = params["w3"], params["b3"]

    batch, in_dim = state.shape
    fc1_dim = w1.shape[1]
    fc2_dim = w2.shape[1]
    out_dim = w3.shape[1]

    # --- lane-dense output: pad fc3's output axis to a multiple of 128 lanes -----------
    out_pad = _round_up(out_dim, 128)
    if out_pad != out_dim:
        w3 = jnp.pad(w3, ((0, 0), (0, out_pad - out_dim)))
        b3 = jnp.pad(b3, ((0, 0), (0, out_pad - out_dim)))

    # --- choose a batch tile and pad the batch to a multiple of it ---------------------
    if block_batch is None:
        # Large enough to amortize the ~0.35us/grid-step overhead and fill MXU rows,
        # small enough that double-buffered (x, out) tiles stay far inside the v7x
        # 32 MiB default scoped-VMEM budget (weights here are only ~a few KiB).
        block_batch = min(512, _round_up(batch, 8))
    tb = _round_up(block_batch, 8)
    padded_batch = _round_up(batch, tb)
    if padded_batch != batch:
        state = jnp.pad(state, ((0, padded_batch - batch), (0, 0)))

    # bf16 storage for x/W is the v6e/v7x fast path; biases + accumulation stay f32.
    x = state.astype(compute_dtype)
    w1 = w1.astype(compute_dtype)
    w2 = w2.astype(compute_dtype)
    w3 = w3.astype(compute_dtype)
    b1 = b1.astype(jnp.float32)
    b2 = b2.astype(jnp.float32)
    b3 = b3.astype(jnp.float32)

    grid = (padded_batch // tb,)

    # Weights/biases: full-array blocks with a constant index_map -> VMEM-resident
    # across all batch tiles (blocked specs default to VMEM on TPU).
    def resident(a):
        return pl.BlockSpec(a.shape, lambda i: (0,) * a.ndim)

    dsize = jnp.dtype(compute_dtype).itemsize
    n_wparams = in_dim * fc1_dim + fc1_dim * fc2_dim + fc2_dim * out_pad
    cost = pl.CostEstimate(
        flops=2 * padded_batch * (in_dim * fc1_dim + fc1_dim * fc2_dim + fc2_dim * out_pad),
        transcendentals=0,
        bytes_accessed=(padded_batch * in_dim * dsize          # activations in
                        + padded_batch * out_pad * 4           # Q-value slab out
                        + n_wparams * dsize                    # weights
                        + (fc1_dim + fc2_dim + out_pad) * 4),  # biases
    )

    out_padded = pl.pallas_call(
        dqn_kernel,
        out_shape=jax.ShapeDtypeStruct((padded_batch, out_pad), jnp.float32),
        grid=grid,
        in_specs=[
            pl.BlockSpec((tb, in_dim), lambda i: (i, 0)),   # activation tile: pipelined
            resident(w1), resident(b1),
            resident(w2), resident(b2),
            resident(w3), resident(b3),
        ],
        out_specs=pl.BlockSpec((tb, out_pad), lambda i: (i, 0)),
        compiler_params=pltpu.CompilerParams(
            dimension_semantics=("parallel",),  # shard batch tiles across v7x's 2 TCs
        ),
        cost_estimate=cost,
    )(x, w1, b1, w2, b2, w3, b3)

    return out_padded[:batch, :out_dim]


def init_params(key, input_dim, fc1_dim, fc2_dim, output_dim):
    """Deterministic init mirroring PyTorch nn.Linear default (uniform +/- 1/sqrt(fan_in)),
    with weights stored [in, out] for the kernel."""
    ks = jax.random.split(key, 6)

    def linear(kw, kb, fan_in, fan_out):
        bound = 1.0 / jnp.sqrt(jnp.float32(fan_in))
        w = jax.random.uniform(kw, (fan_in, fan_out), jnp.float32, -bound, bound)
        b = jax.random.uniform(kb, (1, fan_out), jnp.float32, -bound, bound)
        return w, b

    w1, b1 = linear(ks[0], ks[1], input_dim, fc1_dim)
    w2, b2 = linear(ks[2], ks[3], fc1_dim, fc2_dim)
    w3, b3 = linear(ks[4], ks[5], fc2_dim, output_dim)
    return {"w1": w1, "b1": b1, "w2": w2, "b2": b2, "w3": w3, "b3": b3}


if __name__ == "__main__":
    # TODO(synk): Adam optimizer / MSELoss / .to(device) are training-side and not part
    # of the forward kernel.
    batch, input_dim, fc1_dim, fc2_dim, output_dim = 2, 8, 32, 32, 4

    key = jax.random.PRNGKey(0)
    k_params, k_state, k_big = jax.random.split(key, 3)

    params = init_params(k_params, input_dim, fc1_dim, fc2_dim, output_dim)
    state = jax.random.normal(k_state, (batch, input_dim), jnp.float32)

    def ref_fwd(s):
        h1 = jnp.maximum(s @ params["w1"] + params["b1"], 0.0)
        h2 = jnp.maximum(h1 @ params["w2"] + params["b2"], 0.0)
        return h2 @ params["w3"] + params["b3"]

    # Small per-env-step batch (spec-consistent shapes).
    actions = dqn_forward(state, params)
    jax.block_until_ready(actions)
    assert actions.shape == (batch, output_dim)
    assert jnp.allclose(actions, ref_fwd(state), atol=1e-5, rtol=1e-5)

    # Exercise the batch-tiled grid: multiple grid steps + a zero-padded tail tile.
    big_state = jax.random.normal(k_big, (300, input_dim), jnp.float32)
    big_actions = dqn_forward(big_state, params, block_batch=128)
    jax.block_until_ready(big_actions)
    assert big_actions.shape == (300, output_dim)
    assert jnp.allclose(big_actions, ref_fwd(big_state), atol=1e-4, rtol=1e-4)

    print("KERNEL_OK")
</pallas_src>

<mosaic_0001>
module attributes {stable_mosaic.version = 11 : i64} {
  func.func @dqn_kernel(%arg0: i32, %arg1: memref<8x8xf32, #tpu.memory_space<vmem>>, %arg2: memref<8x32xf32, #tpu.memory_space<vmem>>, %arg3: memref<1x32xf32, #tpu.memory_space<vmem>>, %arg4: memref<32x32xf32, #tpu.memory_space<vmem>>, %arg5: memref<1x32xf32, #tpu.memory_space<vmem>>, %arg6: memref<32x128xf32, #tpu.memory_space<vmem>>, %arg7: memref<1x128xf32, #tpu.memory_space<vmem>>, %arg8: memref<8x128xf32, #tpu.memory_space<vmem>>) attributes {dimension_semantics = [#tpu.dimension_semantics<parallel>], iteration_bounds = array<i64: 1>, scalar_prefetch = 0 : i64, scratch_operands = 0 : i64, tpu.core_type = #tpu.core_type<tc>, window_params = [{transform_indices = @transform_0, window_bounds = array<i64: 8, 8>}, {pipeline_mode = #tpu.pipeline_mode<synchronous>, transform_indices = @transform_1, window_bounds = array<i64: 8, 32>}, {pipeline_mode = #tpu.pipeline_mode<synchronous>, transform_indices = @transform_2, window_bounds = array<i64: 1, 32>}, {pipeline_mode = #tpu.pipeline_mode<synchronous>, transform_indices = @transform_3, window_bounds = array<i64: 32, 32>}, {pipeline_mode = #tpu.pipeline_mode<synchronous>, transform_indices = @transform_4, window_bounds = array<i64: 1, 32>}, {pipeline_mode = #tpu.pipeline_mode<synchronous>, transform_indices = @transform_5, window_bounds = array<i64: 32, 128>}, {pipeline_mode = #tpu.pipeline_mode<synchronous>, transform_indices = @transform_6, window_bounds = array<i64: 1, 128>}, {transform_indices = @transform_7, window_bounds = array<i64: 8, 128>}]} {
    %c0 = arith.constant 0 : index
    %c0_0 = arith.constant 0 : index
    %0 = vector.load %arg1[%c0, %c0_0] : memref<8x8xf32, #tpu.memory_space<vmem>>, vector<8x8xf32>
    %c0_1 = arith.constant 0 : index
    %c0_2 = arith.constant 0 : index
    %1 = vector.load %arg2[%c0_1, %c0_2] : memref<8x32xf32, #tpu.memory_space<vmem>>, vector<8x32xf32>
    %cst = arith.constant dense<0.000000e+00> : vector<8x32xf32>
    %2 = tpu.matmul %0, %1, %cst {dimension_numbers = #tpu.dot_dimension_numbers<[1], [0], [0], [1], [0, 0, 1, 1], [], []>} : vector<8x8xf32>, vector<8x32xf32>, vector<8x32xf32> -> vector<8x32xf32>
    %c0_3 = arith.constant 0 : index
    %c0_4 = arith.constant 0 : index
    %3 = vector.load %arg3[%c0_3, %c0_4] : memref<1x32xf32, #tpu.memory_space<vmem>>, vector<1x32xf32>
    %4 = vector.broadcast %3 : vector<1x32xf32> to vector<8x32xf32>
    %5 = arith.addf %2, %4 : vector<8x32xf32>
    %cst_5 = arith.constant 0.000000e+00 : f32
    %6 = vector.broadcast %cst_5 : f32 to vector<8x32xf32>
    %7 = arith.maximumf %5, %6 : vector<8x32xf32>
    %c0_6 = arith.constant 0 : index
    %c0_7 = arith.constant 0 : index
    %8 = vector.load %arg4[%c0_6, %c0_7] : memref<32x32xf32, #tpu.memory_space<vmem>>, vector<32x32xf32>
    %cst_8 = arith.constant dense<0.000000e+00> : vector<8x32xf32>
    %9 = tpu.matmul %7, %8, %cst_8 {dimension_numbers = #tpu.dot_dimension_numbers<[1], [0], [0], [1], [0, 0, 1, 1], [], []>} : vector<8x32xf32>, vector<32x32xf32>, vector<8x32xf32> -> vector<8x32xf32>
    %c0_9 = arith.constant 0 : index
    %c0_10 = arith.constant 0 : index
    %10 = vector.load %arg5[%c0_9, %c0_10] : memref<1x32xf32, #tpu.memory_space<vmem>>, vector<1x32xf32>
    %11 = vector.broadcast %10 : vector<1x32xf32> to vector<8x32xf32>
    %12 = arith.addf %9, %11 : vector<8x32xf32>
    %cst_11 = arith.constant 0.000000e+00 : f32
    %13 = vector.broadcast %cst_11 : f32 to vector<8x32xf32>
    %14 = arith.maximumf %12, %13 : vector<8x32xf32>
    %c0_12 = arith.constant 0 : index
    %c0_13 = arith.constant 0 : index
    %15 = vector.load %arg6[%c0_12, %c0_13] : memref<32x128xf32, #tpu.memory_space<vmem>>, vector<32x128xf32>
    %cst_14 = arith.constant dense<0.000000e+00> : vector<8x128xf32>
    %16 = tpu.matmul %14, %15, %cst_14 {dimension_numbers = #tpu.dot_dimension_numbers<[1], [0], [0], [1], [0, 0, 1, 1], [], []>} : vector<8x32xf32>, vector<32x128xf32>, vector<8x128xf32> -> vector<8x128xf32>
    %c0_15 = arith.constant 0 : index
    %c0_16 = arith.constant 0 : index
    %17 = vector.load %arg7[%c0_15, %c0_16] : memref<1x128xf32, #tpu.memory_space<vmem>>, vector<1x128xf32>
    %18 = vector.broadcast %17 : vector<1x128xf32> to vector<8x128xf32>
    %19 = arith.addf %16, %18 : vector<8x128xf32>
    %c0_17 = arith.constant 0 : index
    %c0_18 = arith.constant 0 : index
    %20 = vector.load %arg8[%c0_17, %c0_18] : memref<8x128xf32, #tpu.memory_space<vmem>>, vector<8x128xf32>
    tpu.vector_store %arg8[%c0_17, %c0_18], %19 {strides = array<i32>} : memref<8x128xf32, #tpu.memory_space<vmem>>, vector<8x128xf32>,
    return
  }
  func.func @transform_0(%arg0: i32) -> (i32, i32) {
    %c0_i32 = arith.constant 0 : i32
    %c0_i32_0 = arith.constant 0 : i32
    return %arg0, %c0_i32 : i32, i32
  }
  func.func @transform_1(%arg0: i32) -> (i32, i32) {
    %c0_i32 = arith.constant 0 : i32
    %c0_i32_0 = arith.constant 0 : i32
    %c0_i32_1 = arith.constant 0 : i32
    return %c0_i32, %c0_i32_0 : i32, i32
  }
  func.func @transform_2(%arg0: i32) -> (i32, i32) {
    %c0_i32 = arith.constant 0 : i32
    %c0_i32_0 = arith.constant 0 : i32
    %c0_i32_1 = arith.constant 0 : i32
    return %c0_i32, %c0_i32_0 : i32, i32
  }
  func.func @transform_3(%arg0: i32) -> (i32, i32) {
    %c0_i32 = arith.constant 0 : i32
    %c0_i32_0 = arith.constant 0 : i32
    %c0_i32_1 = arith.constant 0 : i32
    return %c0_i32, %c0_i32_0 : i32, i32
  }
  func.func @transform_4(%arg0: i32) -> (i32, i32) {
    %c0_i32 = arith.constant 0 : i32
    %c0_i32_0 = arith.constant 0 : i32
    %c0_i32_1 = arith.constant 0 : i32
    return %c0_i32, %c0_i32_0 : i32, i32
  }
  func.func @transform_5(%arg0: i32) -> (i32, i32) {
    %c0_i32 = arith.constant 0 : i32
    %c0_i32_0 = arith.constant 0 : i32
    %c0_i32_1 = arith.constant 0 : i32
    return %c0_i32, %c0_i32_0 : i32, i32
  }
  func.func @transform_6(%arg0: i32) -> (i32, i32) {
    %c0_i32 = arith.constant 0 : i32
    %c0_i32_0 = arith.constant 0 : i32
    %c0_i32_1 = arith.constant 0 : i32
    return %c0_i32, %c0_i32_0 : i32, i32
  }
  func.func @transform_7(%arg0: i32) -> (i32, i32) {
    %c0_i32 = arith.constant 0 : i32
    %c0_i32_0 = arith.constant 0 : i32
    return %arg0, %c0_i32 : i32, i32
  }
}

</mosaic_0001>

<bundles_post_ra>
// kernel: tpu_custom_call.1
= control target key start
LH: loop header
LB: loop body
LE: loop exit
PB: predicated region body
PF: predicated region fallthrough
CT: control target
= control target key end

     0   :  { %12 = vsyncpa [#allocation3], 0  ;;  %s413_s0 = inlined_call_operand.hbm [shape: f32[8,8], index: 0, kind: input, shape index: {}]   ;;  %s414_s1 = inlined_call_operand.hbm [shape: f32[8,32], index: 1, kind: input, shape index: {}]   ;;  %s415_s2 = inlined_call_operand.vmem [shape: f32[1,32], index: 2, kind: input, shape index: {}]   ;;  %s416_s3 = inlined_call_operand.hbm [shape: f32[32,32], index: 3, kind: input, shape index: {}]   ;;  %s417_s4 = inlined_call_operand.vmem [shape: f32[1,32], index: 4, kind: input, shape index: {}]   ;;  %s418_s5 = inlined_call_operand.hbm [shape: f32[32,128], index: 5, kind: input, shape index: {}]   ;;  %s419_s6 = inlined_call_operand.vmem [shape: f32[1,128], index: 6, kind: input, shape index: {}]   ;;  %s420_s7 = inlined_call_operand.hbm [shape: f32[8,128], index: 7, kind: output, shape index: {}]  }
   0x1   :  { %13 = vsyncpa [#allocation6], 0 }
   0x2   :  { %14 = vsyncpa [#allocation9], 0  ;;  %s32_s26 = sshll.u32 %s414_s1, 4  ;;  %s33_s26 = int_to_ptr.hbm [resolvable:$true] %s32_s26 }
   0x3   :  { %15 = vsyncpa [#allocation4], 0  ;;  %s342_s27 = smov [#allocation5]   ;;  %s21_s8 = sshll.u32 %s413_s0, 4  ;;  %s22_s8 = int_to_ptr.hbm [resolvable:$true] %s21_s8 }
   0x4   :  { %s34_s28 = sshll.u32 %s342_s27, 4  ;;  %s343_s9 = smov [#allocation2]   ;;  %s35_s28 = int_to_ptr.vmem [resolvable:$true] %s34_s28 }
   0x5   :  { %37 = dma.hbm_to_vmem [thread:$0]  %s33_s26, 128, %s35_s28, [#allocation6]  }
   0x6   :  { %s23_s10 = sshll.u32 %s343_s9, 4  ;;  %s44_s13 = sshll.u32 %s416_s3, 4  ;;  %s24_s10 = int_to_ptr.vmem [resolvable:$true] %s23_s10  ;;  %s45_s13 = int_to_ptr.hbm [resolvable:$true] %s44_s13 }
   0x7   :  { %26 = dma.hbm_to_vmem [thread:$0]  %s22_s8, 128, %s24_s10, [#allocation3]  }
   0x8   :  { %s344_s1 = smov [#allocation7]   ;;  %s59_s17 = sshll.u32 %s418_s5, 4  ;;  %s60_s17 = int_to_ptr.hbm [resolvable:$true] %s59_s17 }
   0x9   :  { %s46_s14 = sshll.u32 %s344_s1, 4  ;;  %s345_s18 = smov 128   ;;  %s47_s14 = int_to_ptr.vmem [resolvable:$true] %s46_s14 }
   0xa   :  { %s346_s0 = smov 8   ;;  %s347_s19 = smov [#allocation8]  }
   0xb   :  { %52 = dma.hbm_to_vmem [thread:$0]  %s45_s13, 512, %s47_s14, [#allocation6], %s345_s18, %s345_s18, %s346_s0  }
   0xc   :  { %s61_s20 = sshll.u32 %s347_s19, 4  ;;  %s62_s20 = int_to_ptr.vmem [resolvable:$true] %s61_s20 }
   0xd   :  { %67 = dma.hbm_to_vmem [thread:$0]  %s60_s17, 512, %s62_s20, [#allocation9], %s345_s18, %s345_s18, %s346_s0  }
   0xe   :  { %334 = dma.done.wait [#allocation3], 128  }
   0xf   :  { %335 = vsyncadd [#allocation3], 4294967168 }
  0x10   :  { %336 = dma.done.wait [#allocation6], 640  }
  0x11   :  { %337 = vsyncadd [#allocation6], 4294966656 }
  0x12   :  { %338 = dma.done.wait [#allocation9], 512  }
  0x13   :  { %339 = vsyncadd [#allocation9], 4294966784  ;;  %vm92_vm0 = vcmask 64512   ;;  %v87_v0 = vld [vmem:[#allocation5] sm:$0xff]  ;;  %v86_v1 = vld [vmem:[#allocation2] sm:$0xff]  ;;  %vm125_vm1 = vcmask 261120  }
  0x14   :  { %v120_v2 = vld [vmem:[#allocation7 + $0x18] sm:$0xff]  ;;  %111 = vmatpush.msra.mxu0 %v87_v0  ;;  %v119_v3 = vld [vmem:[#allocation7 + $0x10] sm:$0xff]  ;;  %v118_v4 = vld [vmem:[#allocation7 + $0x8] sm:$0xff]  ;;  %s348_s24 = smov [#allocation10]   ;;  %s189_s28 = sshll.u32 %s420_s7, 4  ;;  %s190_s28 = int_to_ptr.hbm [resolvable:$true] %s189_s28 }
  0x15   :  { %141 = vmatpush.msra.mxu1 %v120_v2  ;;  %201 = vmatmul.msk.f32.vlgmr.msra.gmra.mxu0 %vm92_vm0, %v86_v1  ;;  %v117_v5 = vld [vmem:[#allocation7] sm:$0xff]  ;;  %v153_v6 = vld [vmem:[#allocation8 + $0x18] sm:$0xff]  ;;  %v211_v7 = vld [vmem:[%s415_s2] ss:$0 sm:$0xff]  ;;  %s187_s25 = sshll.u32 %s348_s24, 4  ;;  %s188_s25 = int_to_ptr.vmem [resolvable:$true] %s187_s25 }
  0x16   :  { %173 = vmatpush.msra.mxu2 %v153_v6  ;;  %v152_v11 = vld [vmem:[#allocation8 + $0x10] sm:$0xff]  ;;  %v151_v12 = vld [vmem:[#allocation8 + $0x8] sm:$0xff]  ;;  %v150_v13 = vld [vmem:[#allocation8] sm:$0xff] }
  0x17   :  { %142 = vmatpush.msra.mxu1 %v119_v3  ;;  %v212_v14 = vld [vmem:[%s417_s4] ss:$0 sm:$0xff] }
  0x18   :  { %174 = vmatpush.msra.mxu2 %v152_v11  ;;  %v213_v18 = vld [vmem:[%s419_s6] ss:$0 sm:$0xff] }
  0x19   :  { %143 = vmatpush.msra.mxu1 %v118_v4 }
  0x1a   :  { %175 = vmatpush.msra.mxu2 %v151_v12 }
  0x1b   :  { %144 = vmatpush.msra.mxu1 %v117_v5 }
  0x1c   :  { %176 = vmatpush.msra.mxu2 %v150_v13 }
  0x92   :  { %v113_v8 = vpop.f32.mrf.mxu0 }
  0x93   :  { %v114_v9 = vadd.f32 %v211_v7, %v113_v8 }
  0x95   :  { %v116_v10 = vmax.f32 %v114_v9, 0.0 }
  0x97   :  { %202 = vmatmul.msk.f32.vlgmr.msra.gmra.mxu1 %vm125_vm1, %v116_v10 }
 0x114   :  { %v146_v15 = vpop.f32.mrf.mxu1 }
 0x115   :  { %v147_v16 = vadd.f32 %v212_v14, %v146_v15 }
 0x117   :  { %v149_v17 = vmax.f32 %v147_v16, 0.0 }
 0x119   :  { %203 = vmatmul.msk.f32.vlgmr.msra.gmra.mxu2 %vm125_vm1, %v149_v17 }
 0x19c   :  { %v178_v19 = vpop.f32.mrf.mxu2 }
 0x19d   :  { %v179_v20 = vadd.f32 %v213_v18, %v178_v19 }
 0x19f   :  { %181 = vst [vmem:[#allocation10] sm:$0xff] %v179_v20 }
 0x1a0   :  { %192 = dma.vmem_to_hbm [thread:$0]  %s188_s25, 128, %s190_s28, [#allocation4]  }
 0x1a1   :  { %340 = dma.done.wait [#allocation4], 128  }
 0x1a2   :  { %341 = vsyncadd [#allocation4], 4294967168 }
 0x1a3   :  { %197 = vsyncpa [#allocation3], 1 }
 0x1a4   :  { %198 = vsyncpa [#allocation6], 1 }
 0x1a5   :  { %199 = vsyncpa [#allocation9], 1 }
 0x1a6   :  { %200 = vsyncpa [#allocation4], 1 }

</bundles_post_ra>
